<compile_context>
chip_gen: v5e
topology: v5e:2x2
jax: 0.10.0
libtpu: 0.0.40
codegen_flags: <defaults>
</compile_context>

<pallas_src>
import numpy as np
import jax
import jax.numpy as jnp
from jax.experimental import pallas as pl
from jax.experimental.pallas import tpu as pltpu


def _vmem_capacity_bytes() -> int:
    """Best-effort VMEM capacity query; conservative (v7x-class) fallback."""
    try:
        info = pltpu.get_tpu_info()
        for attr in ("vmem_capacity_bytes", "vmem_bytes"):
            v = getattr(info, attr, None)
            if v:
                return int(v)
    except Exception:
        pass
    return 64 << 20


def _pick_tile_n(n_rows: int, n_cls: int, vmem_budget_bytes: int) -> int:
    """Largest row tile such that ~7 f32 (tile_n, C) row-copies (double
    buffered input + live elementwise temporaries after the sel_w*z trim)
    stay within the per-chip VMEM budget."""
    per_row_bytes = 7 * n_cls * 4
    tile = max(8, vmem_budget_bytes // per_row_bytes)
    tile = min(tile, 1024)                       # per-step overhead already amortized
    n_pad = ((n_rows + 7) // 8) * 8
    tile = min(tile, n_pad)                      # don't over-allocate for small N
    tile = max(8, (tile // 8) * 8)               # sublane multiple of 8
    return int(tile)


def _make_ce_kernel(n_total: int, n_inner: int, tile_n: int,
                    smooth: float, has_weight: bool):
    """Builds the Pallas kernel. grid = (n_outer ['parallel'], n_inner ['arbitrary'])."""
    inv_n = 1.0 / float(n_total)
    smooth = float(smooth)

    def compute(tgt_ref, x_ref, w_ref, out_ref, acc_ref):
        o = pl.program_id(0)
        i = pl.program_id(1)

        @pl.when(i == 0)
        def _():
            acc_ref[...] = jnp.zeros_like(acc_ref)

        x = x_ref[...].astype(jnp.float32)                    # (tn, C), f32 math
        tn, C = x.shape

        # Numerically stable log-softmax pieces along the class (lane) axis.
        m = jnp.max(x, axis=-1, keepdims=True)
        z = x - m
        lse = jnp.log(jnp.sum(jnp.exp(z), axis=-1, keepdims=True))   # (tn, 1)

        # One iota-compare mask feeds the gather(s); exactly one class matches
        # per in-range row, so w[y]*z[y] == w_y * z_y (no (tn,C) multiply).
        col = jax.lax.broadcasted_iota(jnp.int32, (tn, C), 1)
        mask = col == tgt_ref[...]
        z_y = jnp.sum(jnp.where(mask, z, 0.0), axis=-1, keepdims=True)   # z[y]

        if has_weight:
            w_y = jnp.sum(jnp.where(mask, w_ref[...], 0.0), axis=-1, keepdims=True)
            row = w_y * (lse - z_y)                            # (tn, 1)
        else:
            row = lse - z_y                                    # weight == 1 path

        if smooth > 0.0:
            sum_z = jnp.sum(z, axis=-1, keepdims=True)
            row = (1.0 - smooth) * row + (smooth / C) * (C * lse - sum_z)

        # Mask rows beyond N (partial last block and the clamped overhang block
        # of the 2-way outer split).
        # TODO(synk): out-of-range labels silently contribute 0 instead of
        # raising like PyTorch's indexing would.
        row_start = (o * n_inner + i) * tile_n
        ridx = jax.lax.broadcasted_iota(jnp.int32, (tn, 1), 0) + row_start
        row = jnp.where(ridx < n_total, row, 0.0)

        # Per-row VMEM accumulator; no output traffic until the epilogue.
        acc_ref[...] += row

        @pl.when(i == pl.num_programs(1) - 1)
        def _():
            total = jnp.sum(acc_ref[...]) * inv_n              # scalar partial (carries 1/N)
            out_ref[...] = jnp.zeros(out_ref.shape, out_ref.dtype) + total

    if has_weight:
        def kernel(tgt_ref, x_ref, w_ref, out_ref, acc_ref):
            compute(tgt_ref, x_ref, w_ref, out_ref, acc_ref)
    else:
        def kernel(tgt_ref, x_ref, out_ref, acc_ref):
            compute(tgt_ref, x_ref, None, out_ref, acc_ref)
    return kernel


def cross_entropy_pallas(x, target, weight=None, smooth=0.0, tile_n=None):
    """x: [N, C] float logits (kept in their HBM dtype), target: [N] int labels,
    weight: [C] or None, smooth: float."""
    N, C = x.shape
    has_weight = weight is not None
    tgt2 = target.astype(jnp.int32).reshape(N, 1)

    # Per-chip VMEM budgeting: large tiles on 128-MiB-VMEM v5e/v6e, conservative
    # on v7x's 64 MiB physical VMEM.
    vmem_cap = _vmem_capacity_bytes()
    if vmem_cap >= (100 << 20):        # v5e / v6e class
        vmem_limit = 64 << 20
        tile_budget = 40 << 20
    else:                              # v7x class
        vmem_limit = 32 << 20
        tile_budget = 14 << 20

    if tile_n is None:
        tile_n = _pick_tile_n(N, C, tile_budget)
    tile_n = max(8, (int(tile_n) // 8) * 8)

    total_blocks = pl.cdiv(N, tile_n)
    # Split the N reduction 2-way on the outer ("parallel") axis so v7x's two
    # TensorCores each take half.  Odd block counts duplicate the last block on
    # the second half; its index is clamped below and the in-kernel row mask
    # zeroes its contribution.  Harmless (tiny extra epilogue) on 1-TC chips.
    n_outer = 2 if total_blocks >= 2 else 1
    n_inner = pl.cdiv(total_blocks, n_outer)
    last_blk = total_blocks - 1

    def blk_idx(o, i):
        return jnp.minimum(o * n_inner + i, last_blk)

    in_specs = [
        pl.BlockSpec((tile_n, 1), lambda o, i: (blk_idx(o, i), 0)),   # targets
        pl.BlockSpec((tile_n, C), lambda o, i: (blk_idx(o, i), 0)),   # logits (HBM dtype)
    ]
    args = [tgt2, x]
    if has_weight:
        w2 = jnp.asarray(weight, jnp.float32).reshape(1, C)
        in_specs.append(pl.BlockSpec((1, C), lambda o, i: (0, 0)))    # class weights
        args.append(w2)

    # TODO(synk): for very large vocabularies (C >= ~32K) add a class-axis grid
    # dimension with an online logsumexp so tile_n stays large within VMEM.

    kernel = _make_ce_kernel(N, n_inner, tile_n, float(smooth), has_weight)
    bytes_accessed = int(N * C * x.dtype.itemsize + N * 4
                         + (C * 4 if has_weight else 0) + n_outer * 128 * 4)
    partials = pl.pallas_call(
        kernel,
        out_shape=jax.ShapeDtypeStruct((n_outer, 1, 128), jnp.float32),
        grid_spec=pltpu.PrefetchScalarGridSpec(
            num_scalar_prefetch=0,
            grid=(n_outer, n_inner),
            in_specs=in_specs,
            out_specs=pl.BlockSpec((1, 1, 128), lambda o, i: (o, 0, 0)),  # per-core partial
            scratch_shapes=[pltpu.VMEM((tile_n, 1), jnp.float32)],        # per-row accumulator
        ),
        compiler_params=pltpu.CompilerParams(
            dimension_semantics=("parallel", "arbitrary"),
            vmem_limit_bytes=vmem_limit,
        ),
        cost_estimate=pl.CostEstimate(
            flops=int(10 * N * C),
            transcendentals=int(N * C),
            bytes_accessed=bytes_accessed,
        ),
    )(*args)

    # Each partial already carries the 1/N factor; just sum the per-core pieces.
    return jnp.sum(partials[:, 0, 0])


def cross_entropy_ref(x, target, weight=None, smooth=0.0):
    """Pure-JAX reference matching the PyTorch module semantics."""
    C = x.shape[-1]
    t = jax.nn.one_hot(target, C, dtype=jnp.float32)
    if weight is not None:
        t = t * jnp.asarray(weight, jnp.float32)
    if smooth > 0:
        t = t * (1.0 - smooth) + smooth / C
    logp = jax.nn.log_softmax(x.astype(jnp.float32), axis=-1)
    loss = -t * logp
    return loss.mean(0).sum()


if __name__ == "__main__":
    key = jax.random.PRNGKey(0)
    k1, k2, k3, k4, k5, k6 = jax.random.split(key, 6)

    # TODO(synk): the `target.shape == x.shape` soft-label branch of forward()
    # is not exercised here; only integer-label targets are handled.

    # Case 1: N not a multiple of 8/tile (in-kernel row masking), per-class
    # weights + label smoothing, f32 logits, auto tile size, single block.
    N, C = 19, 32
    x = jax.random.normal(k1, (N, C), dtype=jnp.float32)
    target = jax.random.randint(k2, (N,), 0, C, dtype=jnp.int32)
    weight = jnp.asarray(np.linspace(0.5, 1.5, C, dtype=np.float32))
    smooth = 0.1
    loss1 = jax.block_until_ready(
        cross_entropy_pallas(x, target, weight=weight, smooth=smooth))
    ref1 = cross_entropy_ref(x, target, weight=weight, smooth=smooth)
    assert np.allclose(np.asarray(loss1), np.asarray(ref1), rtol=2e-5, atol=2e-5), (
        f"case1 mismatch: pallas={loss1} ref={ref1}")

    # Case 2: even multi-block reduction with the 2-way outer split (tile_n=8
    # -> 4 blocks), bf16 logits streamed in HBM dtype, specialized no-weight
    # path, no smoothing.
    N2, C2 = 32, 32
    x2 = jax.random.normal(k3, (N2, C2), dtype=jnp.float32).astype(jnp.bfloat16)
    target2 = jax.random.randint(k4, (N2,), 0, C2, dtype=jnp.int32)
    loss2 = jax.block_until_ready(
        cross_entropy_pallas(x2, target2, weight=None, smooth=0.0, tile_n=8))
    ref2 = cross_entropy_ref(x2, target2, weight=None, smooth=0.0)
    assert np.allclose(np.asarray(loss2), np.asarray(ref2), rtol=2e-5, atol=2e-5), (
        f"case2 mismatch: pallas={loss2} ref={ref2}")

    # Case 3: odd block count (tile_n=8 -> 5 blocks) exercising the clamped
    # overhang block of the 2-way split, with weights + smoothing.
    N3, C3 = 40, 64
    x3 = jax.random.normal(k5, (N3, C3), dtype=jnp.float32)
    target3 = jax.random.randint(k6, (N3,), 0, C3, dtype=jnp.int32)
    weight3 = jnp.asarray(np.linspace(0.25, 2.0, C3, dtype=np.float32))
    loss3 = jax.block_until_ready(
        cross_entropy_pallas(x3, target3, weight=weight3, smooth=0.05, tile_n=8))
    ref3 = cross_entropy_ref(x3, target3, weight=weight3, smooth=0.05)
    assert np.allclose(np.asarray(loss3), np.asarray(ref3), rtol=2e-5, atol=2e-5), (
        f"case3 mismatch: pallas={loss3} ref={ref3}")

    print("KERNEL_OK")
</pallas_src>

<mosaic_0001>
module attributes {stable_mosaic.version = 11 : i64} {
  func.func @kernel(%arg0: i32, %arg1: i32, %arg2: memref<24x1xi32, #tpu.memory_space<vmem>>, %arg3: memref<24x32xf32, #tpu.memory_space<vmem>>, %arg4: memref<1x32xf32, #tpu.memory_space<vmem>>, %arg5: memref<1x1x128xf32, #tpu.memory_space<vmem>>, %arg6: memref<24x1xf32, #tpu.memory_space<vmem>>) attributes {dimension_semantics = [#tpu.dimension_semantics<parallel>, #tpu.dimension_semantics<arbitrary>], iteration_bounds = array<i64: 1, 1>, scalar_prefetch = 0 : i64, scratch_operands = 1 : i64, tpu.core_type = #tpu.core_type<tc>, window_params = [{transform_indices = @transform_0, window_bounds = array<i64: 24, 1>}, {transform_indices = @transform_1, window_bounds = array<i64: 24, 32>}, {pipeline_mode = #tpu.pipeline_mode<synchronous>, transform_indices = @transform_2, window_bounds = array<i64: 1, 32>}, {transform_indices = @transform_3, window_bounds = array<i64: 1, 1, 128>}]} {
    %c0_i32 = arith.constant 0 : i32
    %0 = arith.cmpi eq, %arg1, %c0_i32 : i32
    %1 = arith.extui %0 : i1 to i32
    %c0_i32_0 = arith.constant 0 : i32
    %2 = arith.cmpi ne, %1, %c0_i32_0 : i32
    scf.if %2 {
      %cst_22 = arith.constant 0.000000e+00 : f32
      %55 = vector.broadcast %cst_22 : f32 to vector<24x1xf32>
      %c0_23 = arith.constant 0 : index
      %c0_24 = arith.constant 0 : index
      %56 = vector.load %arg6[%c0_23, %c0_24] : memref<24x1xf32, #tpu.memory_space<vmem>>, vector<24x1xf32>
      tpu.vector_store %arg6[%c0_23, %c0_24], %55 {strides = array<i32>} : memref<24x1xf32, #tpu.memory_space<vmem>>, vector<24x1xf32>,
    } else {
    }
    %c0 = arith.constant 0 : index
    %c0_1 = arith.constant 0 : index
    %3 = vector.load %arg3[%c0, %c0_1] : memref<24x32xf32, #tpu.memory_space<vmem>>, vector<24x32xf32>
    %cst = arith.constant dense<0xFF800000> : vector<24xf32>
    %4 = vector.multi_reduction <maximumf>, %3, %cst [1] : vector<24x32xf32> to vector<24xf32>
    %5 = vector.shape_cast %4 : vector<24xf32> to vector<24x1xf32>
    %6 = vector.broadcast %5 : vector<24x1xf32> to vector<24x32xf32>
    %7 = arith.subf %3, %6 : vector<24x32xf32>
    %8 = math.exp %7 : vector<24x32xf32>
    %cst_2 = arith.constant dense<0.000000e+00> : vector<24xf32>
    %9 = vector.multi_reduction <add>, %8, %cst_2 [1] : vector<24x32xf32> to vector<24xf32>
    %10 = vector.shape_cast %9 : vector<24xf32> to vector<24x1xf32>
    %11 = math.log %10 : vector<24x1xf32>
    %12 = tpu.iota {dimensions = array<i32: 1>} : vector<24x32xi32>
    %c0_3 = arith.constant 0 : index
    %c0_4 = arith.constant 0 : index
    %13 = vector.load %arg2[%c0_3, %c0_4] : memref<24x1xi32, #tpu.memory_space<vmem>>, vector<24x1xi32>
    %14 = vector.broadcast %13 : vector<24x1xi32> to vector<24x32xi32>
    %15 = arith.cmpi eq, %12, %14 : vector<24x32xi32>
    %cst_5 = arith.constant 0.000000e+00 : f32
    %16 = vector.broadcast %cst_5 : f32 to vector<24x32xf32>
    %17 = arith.select %15, %7, %16 : vector<24x32xi1>, vector<24x32xf32>
    %cst_6 = arith.constant dense<0.000000e+00> : vector<24xf32>
    %18 = vector.multi_reduction <add>, %17, %cst_6 [1] : vector<24x32xf32> to vector<24xf32>
    %19 = vector.shape_cast %18 : vector<24xf32> to vector<24x1xf32>
    %c0_7 = arith.constant 0 : index
    %c0_8 = arith.constant 0 : index
    %20 = vector.load %arg4[%c0_7, %c0_8] : memref<1x32xf32, #tpu.memory_space<vmem>>, vector<1x32xf32>
    %cst_9 = arith.constant 0.000000e+00 : f32
    %21 = vector.shape_cast %20 : vector<1x32xf32> to vector<1x32xf32>
    %22 = vector.broadcast %21 : vector<1x32xf32> to vector<24x32xf32>
    %23 = vector.broadcast %cst_9 : f32 to vector<24x32xf32>
    %24 = arith.select %15, %22, %23 : vector<24x32xi1>, vector<24x32xf32>
    %cst_10 = arith.constant dense<0.000000e+00> : vector<24xf32>
    %25 = vector.multi_reduction <add>, %24, %cst_10 [1] : vector<24x32xf32> to vector<24xf32>
    %26 = vector.shape_cast %25 : vector<24xf32> to vector<24x1xf32>
    %27 = arith.subf %11, %19 : vector<24x1xf32>
    %28 = arith.mulf %26, %27 : vector<24x1xf32>
    %cst_11 = arith.constant dense<0.000000e+00> : vector<24xf32>
    %29 = vector.multi_reduction <add>, %7, %cst_11 [1] : vector<24x32xf32> to vector<24xf32>
    %30 = vector.shape_cast %29 : vector<24xf32> to vector<24x1xf32>
    %cst_12 = arith.constant 0.899999976 : f32
    %31 = vector.broadcast %cst_12 : f32 to vector<24x1xf32>
    %32 = arith.mulf %31, %28 : vector<24x1xf32>
    %cst_13 = arith.constant 3.200000e+01 : f32
    %33 = vector.broadcast %cst_13 : f32 to vector<24x1xf32>
    %34 = arith.mulf %33, %11 : vector<24x1xf32>
    %35 = arith.subf %34, %30 : vector<24x1xf32>
    %cst_14 = arith.constant 3.125000e-03 : f32
    %36 = vector.broadcast %cst_14 : f32 to vector<24x1xf32>
    %37 = arith.mulf %36, %35 : vector<24x1xf32>
    %38 = arith.addf %32, %37 : vector<24x1xf32>
    %c1_i32 = arith.constant 1 : i32
    %39 = arith.muli %arg0, %c1_i32 : i32
    %40 = arith.addi %39, %arg1 : i32
    %c24_i32 = arith.constant 24 : i32
    %41 = arith.muli %40, %c24_i32 : i32
    %42 = tpu.iota {dimensions = array<i32: 0>} : vector<24x1xi32>
    %43 = vector.broadcast %41 : i32 to vector<24x1xi32>
    %44 = arith.addi %42, %43 : vector<24x1xi32>
    %c19_i32 = arith.constant 19 : i32
    %45 = vector.broadcast %c19_i32 : i32 to vector<24x1xi32>
    %46 = arith.cmpi slt, %44, %45 : vector<24x1xi32>
    %cst_15 = arith.constant 0.000000e+00 : f32
    %47 = vector.broadcast %cst_15 : f32 to vector<24x1xf32>
    %48 = arith.select %46, %38, %47 : vector<24x1xi1>, vector<24x1xf32>
    %c0_16 = arith.constant 0 : index
    %c0_17 = arith.constant 0 : index
    %49 = vector.load %arg6[%c0_16, %c0_17] : memref<24x1xf32, #tpu.memory_space<vmem>>, vector<24x1xf32>
    %50 = arith.addf %49, %48 : vector<24x1xf32>
    %c0_18 = arith.constant 0 : index
    %c0_19 = arith.constant 0 : index
    %51 = vector.load %arg6[%c0_18, %c0_19] : memref<24x1xf32, #tpu.memory_space<vmem>>, vector<24x1xf32>
    tpu.vector_store %arg6[%c0_18, %c0_19], %50 {strides = array<i32>} : memref<24x1xf32, #tpu.memory_space<vmem>>, vector<24x1xf32>,
    %c0_i32_20 = arith.constant 0 : i32
    %52 = arith.cmpi eq, %arg1, %c0_i32_20 : i32
    %53 = arith.extui %52 : i1 to i32
    %c0_i32_21 = arith.constant 0 : i32
    %54 = arith.cmpi ne, %53, %c0_i32_21 : i32
    scf.if %54 {
      %c0_22 = arith.constant 0 : index
      %c0_23 = arith.constant 0 : index
      %55 = vector.load %arg6[%c0_22, %c0_23] : memref<24x1xf32, #tpu.memory_space<vmem>>, vector<24x1xf32>
      %56 = vector.shape_cast %55 : vector<24x1xf32> to vector<1x24x1xf32>
      %cst_24 = arith.constant dense<0.000000e+00> : vector<1xf32>
      %57 = vector.multi_reduction <add>, %56, %cst_24 [1, 2] : vector<1x24x1xf32> to vector<1xf32>
      %58 = vector.shape_cast %57 : vector<1xf32> to vector<1x1x1xf32>
      %59 = vector.extract %58[0, 0, 0] : f32 from vector<1x1x1xf32>
      %cst_25 = arith.constant 0.0526315793 : f32
      %60 = arith.mulf %59, %cst_25 : f32
      %cst_26 = arith.constant 0.000000e+00 : f32
      %61 = vector.broadcast %cst_26 : f32 to vector<1x1x128xf32>
      %62 = vector.broadcast %60 : f32 to vector<1x1x128xf32>
      %63 = arith.addf %61, %62 : vector<1x1x128xf32>
      %c0_27 = arith.constant 0 : index
      %c0_28 = arith.constant 0 : index
      %c0_29 = arith.constant 0 : index
      %64 = vector.load %arg5[%c0_27, %c0_28, %c0_29] : memref<1x1x128xf32, #tpu.memory_space<vmem>>, vector<1x1x128xf32>
      tpu.vector_store %arg5[%c0_27, %c0_28, %c0_29], %63 {strides = array<i32>} : memref<1x1x128xf32, #tpu.memory_space<vmem>>, vector<1x1x128xf32>,
    } else {
    }
    return
  }
  func.func @transform_0(%arg0: i32, %arg1: i32) -> (i32, i32) {
    %c1_i32 = arith.constant 1 : i32
    %0 = arith.muli %arg0, %c1_i32 : i32
    %1 = arith.addi %0, %arg1 : i32
    %c0_i32 = arith.constant 0 : i32
    %2 = arith.minsi %1, %c0_i32 : i32
    %c0_i32_0 = arith.constant 0 : i32
    %c0_i32_1 = arith.constant 0 : i32
    return %2, %c0_i32_0 : i32, i32
  }
  func.func @transform_1(%arg0: i32, %arg1: i32) -> (i32, i32) {
    %c1_i32 = arith.constant 1 : i32
    %0 = arith.muli %arg0, %c1_i32 : i32
    %1 = arith.addi %0, %arg1 : i32
    %c0_i32 = arith.constant 0 : i32
    %2 = arith.minsi %1, %c0_i32 : i32
    %c0_i32_0 = arith.constant 0 : i32
    %c0_i32_1 = arith.constant 0 : i32
    return %2, %c0_i32_0 : i32, i32
  }
  func.func @transform_2(%arg0: i32, %arg1: i32) -> (i32, i32) {
    %c0_i32 = arith.constant 0 : i32
    %c0_i32_0 = arith.constant 0 : i32
    %c0_i32_1 = arith.constant 0 : i32
    return %c0_i32, %c0_i32_0 : i32, i32
  }
  func.func @transform_3(%arg0: i32, %arg1: i32) -> (i32, i32, i32) {
    %c0_i32 = arith.constant 0 : i32
    %c0_i32_0 = arith.constant 0 : i32
    %c0_i32_1 = arith.constant 0 : i32
    return %arg0, %c0_i32, %c0_i32_0 : i32, i32, i32
  }
}

</mosaic_0001>

<bundles_post_ra>
// kernel: tpu_custom_call.1
= control target key start
LH: loop header
LB: loop body
LE: loop exit
PB: predicated region body
PF: predicated region fallthrough
CT: control target
= control target key end

     0   :  { %vm90_vm0 = vcmask 261120   ;;  %v324_v4 = vmov 0   ;;  %s399_s0 = inlined_call_operand.vmem [shape: s32[19,1], index: 0, kind: input, shape index: {}]   ;;  %s400_s1 = inlined_call_operand.vmem [shape: f32[19,32], index: 1, kind: input, shape index: {}]   ;;  %s401_s2 = inlined_call_operand.vmem [shape: f32[1,32], index: 2, kind: input, shape index: {}]   ;;  %s402_s3 = inlined_call_operand.hbm [shape: f32[1,1,128], index: 3, kind: output, shape index: {}]  }
   0x1   :  { %v89_v0 = vld [vmem:[%s400_s1 + $0x10] sm:$0xff]  ;;  %v87_v1 = vld [vmem:[%s400_s1] sm:$0xff]  ;;  %283 = vset.pattern.permute.xlu2 %v324_v4  ;;  %v127_v5 = vld [vmem:[%s399_s0 + $0x8] sm:$0xff]  ;;  %282 = vset.pattern.permute.xlu1 %v324_v4 }
   0x2   :  { %v97_v2 = vsel %vm90_vm0, %v89_v0, -inf  ;;  %v91_v3 = vsel %vm90_vm0, %v87_v1, -inf }
   0x3   :  { %98 = vmax.xlane.f32.xlu1 %v97_v2  ;;  %92 = vmax.xlane.f32.xlu0 %v91_v3 }
   0x4   :  { %8 = vsyncpa [#allocation4], 0  ;;  %133 = vperm.xlu2 %283, %v127_v5   ;;  %284 = vset.pattern.permute.xlu0 %v324_v4  ;;  %v88_v6 = vld [vmem:[%s400_s1 + $0x8] sm:$0xff]  ;;  %v128_v8 = vld [vmem:[%s399_s0 + $0x10] sm:$0xff]  ;;  %v124_v11 = vlaneseq  ;;  %vm83_vm4 = vcmask 7168   ;;  %v325_v47 = vmov 0.0  }
   0x5   :  { %v94_v7 = vsel %vm90_vm0, %v88_v6, -inf  ;;  %v126_v9 = vld [vmem:[%s399_s0] sm:$0xff]  ;;  %84 = vst.msk [vmem:[#allocation2] sm:$0xff] %vm83_vm4, %v325_v47  ;;  %s256_s27 = sshll.u32 %s402_s3, 4  ;;  %s257_s27 = int_to_ptr.hbm [resolvable:$true] %s256_s27 }
   0x6   :  { %v125_v12 = vand.u32 127, %v124_v11  ;;  %v285_v28 = vld [vmem:[%s401_s2] ss:$0 sm:$0xff]  ;;  %85 = vst.msk [vmem:[#allocation2 + $0x8] sm:$0xff] %vm83_vm4, %v325_v47  ;;  %s326_s2 = smov [#allocation3]  }
   0x7   :  { %86 = vst.msk [vmem:[#allocation2 + $0x10] sm:$0xff] %vm83_vm4, %v325_v47  ;;  %s254_s24 = sshll.u32 %s326_s2, 4  ;;  %s255_s24 = int_to_ptr.vmem [resolvable:$true] %s254_s24 }
   0xb   :  { %95 = vmax.xlane.f32.xlu0 %v94_v7 }
   0xc   :  { %136 = vperm.xlu2 %283, %v128_v8  }
  0x1c   :  { %130 = vperm.xlu1 %282, %v126_v9  }
  0x5e   :  { %v134_v13 = vpop.permute.xlu2 %133 }
  0x5f   :  { %vm139_vm1 = vcmp.eq.s32.totalorder %v125_v12, %v134_v13 }
  0x60   :  { %v158_v33 = vsel %vm139_vm1, %v285_v28, 0.0 }
  0x61   :  { %v163_v34 = vsel %vm90_vm0, %v158_v33, 0.0 }
  0x66   :  { %v137_v25 = vpop.permute.xlu2 %136 }
  0x67   :  { %vm140_vm3 = vcmp.eq.s32.totalorder %v125_v12, %v137_v25 }
  0x68   :  { %v159_v29 = vsel %vm140_vm3, %v285_v28, 0.0 }
  0x69   :  { %v166_v31 = vsel %vm90_vm0, %v159_v29, 0.0  ;;  %v217_v29 = vld [vmem:[#allocation2 + $0x10] sm:$0xff] }
  0x76   :  { %v93_v10 = vpop.xlane.xlu0 %92  ;;  %v99_v19 = vpop.xlane.xlu1 %98 }
  0x77   :  { %v100_v22 = vsub.f32 %v87_v1, %v93_v10  ;;  %v102_v35 = vsub.f32 %v89_v0, %v99_v19 }
  0x79   :  { %v175_v27 = vsel %vm90_vm0, %v100_v22, 0.0  ;;  %v103_v36 = vmul.f32 1.442695, %v100_v22  ;;  %v143_v37 = vsel %vm140_vm3, %v102_v35, 0.0  ;;  %v107_v39 = vmul.f32 1.442695, %v102_v35 }
  0x7a   :  { %v150_v38 = vsel %vm90_vm0, %v143_v37, 0.0  ;;  %v181_v45 = vsel %vm90_vm0, %v102_v35, 0.0 }
  0x7e   :  { %v96_v14 = vpop.xlane.xlu0 %95 }
  0x7f   :  { %v101_v15 = vsub.f32 %v88_v6, %v96_v14  ;;  %v215_v6 = vld [vmem:[#allocation2] sm:$0xff] }
  0x81   :  { %v105_v16 = vmul.f32 1.442695, %v101_v15  ;;  %v142_v17 = vsel %vm139_vm1, %v101_v15, 0.0  ;;  %v178_v44 = vsel %vm90_vm0, %v101_v15, 0.0 }
  0x82   :  { %v147_v18 = vsel %vm90_vm0, %v142_v17, 0.0  ;;  %v202_v17 = vshrl.u32 %v124_v11, 7 }
  0x83   :  { %286 = vpow2.f32 %v105_v16  ;;  %148 = vadd.xlane.f32.xlu1 %v147_v18  ;;  %v216_v16 = vld [vmem:[#allocation2 + $0x8] sm:$0xff] }
  0x84   :  { %288 = vpow2.f32 %v103_v36 }
  0x85   :  { %290 = vpow2.f32 %v107_v39 }
  0x89   :  { %v287_v20 = vpop.eup %286 }
  0x8a   :  { %v112_v21 = vsel %vm90_vm0, %v287_v20, 0.0  ;;  %v289_v40 = vpop.eup %288 }
  0x8b   :  { %113 = vadd.xlane.f32.xlu2 %v112_v21  ;;  %v109_v41 = vsel %vm90_vm0, %v289_v40, 0.0  ;;  %v291_v42 = vpop.eup %290 }
  0x8c   :  { %v115_v43 = vsel %vm90_vm0, %v291_v42, 0.0 }
  0x8e   :  { %v131_v23 = vpop.permute.xlu1 %130 }
  0x8f   :  { %vm138_vm2 = vcmp.eq.s32.totalorder %v125_v12, %v131_v23  ;;  %v204_v23 = vadd.s32 16, %v202_v17 }
  0x90   :  { %v141_v24 = vsel %vm138_vm2, %v100_v22, 0.0  ;;  %v157_v30 = vsel %vm138_vm2, %v285_v28, 0.0 }
  0x91   :  { %v144_v26 = vsel %vm90_vm0, %v141_v24, 0.0  ;;  %v160_v32 = vsel %vm90_vm0, %v157_v30, 0.0  ;;  %vm211_vm5 = vcmp.lt.s32.totalorder %v204_v23, 19 }
  0x92   :  { %145 = vadd.xlane.f32.xlu0 %v144_v26 }
  0x93   :  { %176 = vadd.xlane.f32.xlu2 %v175_v27 }
  0x9a   :  { %161 = vadd.xlane.f32.xlu0 %v160_v32 }
  0x9b   :  { %167 = vadd.xlane.f32.xlu2 %v166_v31 }
  0xa2   :  { %164 = vadd.xlane.f32.xlu0 %v163_v34 }
  0xaa   :  { %151 = vadd.xlane.f32.xlu0 %v150_v38 }
  0xb2   :  { %110 = vadd.xlane.f32.xlu0 %v109_v41 }
  0xba   :  { %116 = vadd.xlane.f32.xlu0 %v115_v43 }
  0xc2   :  { %179 = vadd.xlane.f32.xlu0 %v178_v44 }
  0xca   :  { %182 = vadd.xlane.f32.xlu0 %v181_v45 }
  0xf6   :  { %v149_v56 = vpop.xlane.xlu1 %148 }
  0xfe   :  { %v114_v51 = vpop.xlane.xlu2 %113 }
  0xff   :  { %292 = vlog2.f32 %v114_v51 }
 0x105   :  { %v146_v46 = vpop.xlane.xlu0 %145  ;;  %v293_v53 = vpop.eup %292 }
 0x106   :  { %v121_v55 = vmul.f32 0.6931472, %v293_v53  ;;  %v177_v61 = vpop.xlane.xlu2 %176 }
 0x108   :  { %v170_v62 = vsub.f32 %v121_v55, %v149_v56  ;;  %v188_v1 = vmul.f32 32.0, %v121_v55 }
 0x10d   :  { %v162_v48 = vpop.xlane.xlu0 %161 }
 0x10e   :  { %v168_v19 = vpop.xlane.xlu2 %167 }
 0x115   :  { %v165_v49 = vpop.xlane.xlu0 %164 }
 0x116   :  { %v173_v5 = vmul.f32 %v170_v62, %v165_v49 }
 0x118   :  { %v185_v13 = vmul.f32 0.9, %v173_v5 }
 0x11d   :  { %v152_v50 = vpop.xlane.xlu0 %151 }
 0x125   :  { %v111_v52 = vpop.xlane.xlu0 %110 }
 0x126   :  { %294 = vlog2.f32 %v111_v52 }
 0x12c   :  { %v295_v54 = vpop.eup %294 }
 0x12d   :  { %v119_v57 = vmul.f32 0.6931472, %v295_v54  ;;  %v117_v58 = vpop.xlane.xlu0 %116 }
 0x12e   :  { %296 = vlog2.f32 %v117_v58 }
 0x12f   :  { %v169_v59 = vsub.f32 %v119_v57, %v146_v46  ;;  %v187_v60 = vmul.f32 32.0, %v119_v57 }
 0x131   :  { %v172_v63 = vmul.f32 %v169_v59, %v162_v48  ;;  %v190_v0 = vsub.f32 %v187_v60, %v177_v61 }
 0x133   :  { %v184_v2 = vmul.f32 0.9, %v172_v63  ;;  %v193_v3 = vmul.f32 0.003125, %v190_v0 }
 0x134   :  { %v297_v4 = vpop.eup %296 }
 0x135   :  { %v196_v7 = vadd.f32 %v193_v3, %v184_v2  ;;  %v123_v8 = vmul.f32 0.6931472, %v297_v4  ;;  %v180_v9 = vpop.xlane.xlu0 %179 }
 0x136   :  { %v191_v10 = vsub.f32 %v188_v1, %v180_v9 }
 0x137   :  { %v218_v12 = vadd.f32 %v215_v6, %v196_v7  ;;  %v171_v14 = vsub.f32 %v123_v8, %v152_v50  ;;  %v189_v22 = vmul.f32 32.0, %v123_v8 }
 0x138   :  { %v194_v15 = vmul.f32 0.003125, %v191_v10 }
 0x139   :  { %222 = vst.msk [vmem:[#allocation2] sm:$0xff] %vm83_vm4, %v218_v12  ;;  %v174_v21 = vmul.f32 %v171_v14, %v168_v19 }
 0x13a   :  { %v197_v18 = vadd.f32 %v194_v15, %v185_v13 }
 0x13b   :  { %v186_v26 = vmul.f32 0.9, %v174_v21 }
 0x13c   :  { %v219_v20 = vadd.f32 %v216_v16, %v197_v18 }
 0x13d   :  { %v183_v24 = vpop.xlane.xlu0 %182 }
 0x13e   :  { %223 = vst.msk [vmem:[#allocation2 + $0x8] sm:$0xff] %vm83_vm4, %v219_v20  ;;  %v192_v25 = vsub.f32 %v189_v22, %v183_v24 }
 0x140   :  { %v195_v27 = vmul.f32 0.003125, %v192_v25  ;;  %v228_v32 = vld [vmem:[#allocation2] sm:$0xff] }
 0x141   :  { %v231_v34 = vsel %vm83_vm4, %v228_v32, 0.0 }
 0x142   :  { %v198_v28 = vadd.f32 %v195_v27, %v186_v26 }
 0x144   :  { %v214_v30 = vsel %vm211_vm5, %v198_v28, 0.0 }
 0x145   :  { %v220_v31 = vadd.f32 %v217_v29, %v214_v30  ;;  %v229_v11 = vld [vmem:[#allocation2 + $0x8] sm:$0xff] }
 0x146   :  { %v232_v33 = vsel %vm83_vm4, %v229_v11, 0.0 }
 0x147   :  { %224 = vst.msk [vmem:[#allocation2 + $0x10] sm:$0xff] %vm83_vm4, %v220_v31  ;;  %v233_v36 = vadd.f32 %v232_v33, %v231_v34 }
 0x14e   :  { %v230_v35 = vld [vmem:[#allocation2 + $0x10] sm:$0xff] }
 0x14f   :  { %v234_v37 = vsel %vm83_vm4, %v230_v35, 0.0 }
 0x150   :  { %v235_v38 = vadd.f32 %v234_v37, %v233_v36 }
 0x152   :  { %236 = vadd.xlane.f32.xlu2 %v235_v38 }
 0x1c5   :  { %v237_v39 = vpop.xlane.xlu2 %236 }
 0x1c6   :  { %v238_v40 = vrot.slane %v237_v39, 4 }
 0x1c8   :  { %v239_v41 = vadd.f32 %v238_v40, %v237_v39 }
 0x1ca   :  { %v240_v42 = vrot.slane %v239_v41, 2 }
 0x1cc   :  { %v241_v43 = vadd.f32 %v240_v42, %v239_v41 }
 0x1ce   :  { %v242_v44 = vrot.slane %v241_v43, 1 }
 0x1d0   :  { %v243_v45 = vadd.f32 %v242_v44, %v241_v43 }
 0x1d2   :  { %277 = vpush %v243_v45 }
 0x203   :  { %s278_s28 = spop %277 }
 0x204   :  { %s245_s29 = smul.f32 0.05263158, %s278_s28 }
 0x206   :  { %v246_v46 = vstv %s245_s29 }
 0x207   :  { %248 = vst [vmem:[#allocation3] sm:$0x1] %v246_v46 }
 0x208   :  { %259 = dma.vmem_to_hbm [thread:$0]  %s255_s24, 16, %s257_s27, [#allocation4]  }
 0x209   :  { %322 = dma.done.wait [#allocation4], 16  }
 0x20a   :  { %323 = vsyncadd [#allocation4], 4294967280 }
 0x20b   :  { %264 = vsyncpa [#allocation4], 1 }

</bundles_post_ra>
